<compile_context>
chip_gen: v7x
topology: tpu7x:2x2x1
jax: 0.10.0
libtpu: 0.0.40
codegen_flags: <defaults>
</compile_context>

<pallas_src>
import functools

import jax
import jax.numpy as jnp
from jax.experimental import pallas as pl
from jax.experimental.pallas import tpu as pltpu


def _int_pow(x, n: int):
    """x**n via repeated squaring using only VPU multiplies (n >= 1)."""
    acc = None
    while n > 0:
        if n & 1:
            acc = x if acc is None else acc * x
        n >>= 1
        if n:
            x = x * x
    return acc


def _cutoff_kernel(vec_ref, out_ref, *, factor: float, p: float):
    # vec_ref: (3, TE) f32   out_ref: (2, TE) f32 (row 0 = length, row 1 = cutoff)
    v0 = vec_ref[0:1, :]
    v1 = vec_ref[1:2, :]
    v2 = vec_ref[2:3, :]
    sq = v0 * v0 + v1 * v1 + v2 * v2                 # explicit FMAs, no XLU reduce
    length = jnp.sqrt(sq)                            # (1, TE) — single EUP op
    x = length * jnp.float32(factor)

    c0 = jnp.float32((p + 1.0) * (p + 2.0) / 2.0)
    c1 = jnp.float32(p * (p + 2.0))
    c2 = jnp.float32(p * (p + 1.0) / 2.0)

    if float(p).is_integer() and p >= 1.0:
        xp = _int_pow(x, int(p))                     # VPU-only integer power
    else:
        xp = jnp.power(x, jnp.float32(p))            # fallback (non-integral p)

    # 1 - c0*x^p + c1*x^(p+1) - c2*x^(p+2)  ==  1 + x^p * (-c0 + x*(c1 - c2*x))
    cut = jnp.float32(1.0) + xp * (-c0 + x * (c1 - c2 * x))
    cut = jnp.where(x < jnp.float32(1.0), cut, jnp.float32(0.0))

    out_ref[0:1, :] = length.astype(out_ref.dtype)
    out_ref[1:2, :] = cut.astype(out_ref.dtype)


def _pick_tile(E: int, tile_e: int) -> int:
    # Keep >= ~8 grid steps when the edge list is large (megacore / pipelining),
    # but never drop below one lane-width tile (128).
    per_step = (E + 7) // 8
    per_step = max(128, ((per_step + 127) // 128) * 128)
    return max(128, min(int(tile_e), per_step))


def add_radial_cutoff_to_data(pos, edge_index, *, r_max: float, p: float = 6.0,
                              tile_e: int = 8192):
    """Returns dict with edge_vectors, edge_lengths, edge_cutoff (nequip keys)."""
    pos = pos.astype(jnp.float32)
    E = edge_index.shape[1]

    te = _pick_tile(E, tile_e)
    e_pad = pl.cdiv(E, te) * te

    # Pad the (tiny) index list instead of the gathered vector slab: padded
    # edges point at atom 0 - atom 0 = 0-vector (cutoff slice discards them).
    idx_pad = jnp.pad(edge_index, ((0, 0), (0, e_pad - E)))          # (2, E_pad)

    # Row-gather in natural (E, 3) layout (also the returned edge_vectors),
    # transpose once to the lane-dense (3, E_pad) layout the kernel wants.
    edge_vec_pad = pos[idx_pad[1]] - pos[idx_pad[0]]                 # (E_pad, 3)
    vec_t_pad = edge_vec_pad.T                                       # (3, E_pad)

    kernel = functools.partial(_cutoff_kernel, factor=1.0 / float(r_max), p=float(p))

    packed = pl.pallas_call(
        kernel,
        out_shape=jax.ShapeDtypeStruct((2, e_pad), jnp.float32),
        grid_spec=pltpu.PrefetchScalarGridSpec(
            num_scalar_prefetch=0,
            grid=(e_pad // te,),
            in_specs=[pl.BlockSpec((3, te), lambda i: (0, i))],
            out_specs=pl.BlockSpec((2, te), lambda i: (0, i)),
        ),
        compiler_params=pltpu.CompilerParams(
            dimension_semantics=("parallel",)),
    )(vec_t_pad)

    edge_lengths = packed[0, :E]                      # (E,)
    edge_cutoff = packed[1, :E].reshape(E, 1)         # (E, 1) == unsqueeze(-1)
    edge_vectors = edge_vec_pad[:E]                   # (E, 3)
    return {
        "edge_vectors": edge_vectors,
        "edge_lengths": edge_lengths,
        "edge_cutoff": edge_cutoff,
    }


def _poly_cutoff_ref(x, factor, p=6.0):
    x = x * factor
    out = 1.0
    out = out - (p + 1.0) * (p + 2.0) / 2.0 * jnp.power(x, p)
    out = out + p * (p + 2.0) * jnp.power(x, p + 1.0)
    out = out - p * (p + 1.0) / 2.0 * jnp.power(x, p + 2.0)
    return out * (x < 1.0)


if __name__ == "__main__":
    key = jax.random.PRNGKey(0)
    n_atoms, n_edges = 8, 16
    r_max = 2.5

    pos = jax.random.uniform(key, (n_atoms, 3), jnp.float32, minval=-2.0, maxval=2.0)
    # deterministic synthetic edge list (sender/receiver pairs)
    src = jnp.arange(n_edges, dtype=jnp.int32) % n_atoms
    dst = (jnp.arange(n_edges, dtype=jnp.int32) + 3) % n_atoms
    edge_index = jnp.stack([src, dst], axis=0)          # (2, E)

    data = add_radial_cutoff_to_data(pos, edge_index, r_max=r_max, p=6.0)
    jax.block_until_ready(data["edge_cutoff"])

    # reference check in plain JAX
    ev = pos[edge_index[1]] - pos[edge_index[0]]
    el = jnp.linalg.norm(ev, axis=-1)
    ref = _poly_cutoff_ref(el, 1.0 / r_max, 6.0)[:, None]
    assert data["edge_cutoff"].shape == (n_edges, 1)
    assert data["edge_vectors"].shape == (n_edges, 3)
    assert data["edge_lengths"].shape == (n_edges,)
    assert jnp.allclose(data["edge_vectors"], ev, atol=1e-6, rtol=1e-6)
    assert jnp.allclose(data["edge_cutoff"], ref, atol=1e-5, rtol=1e-5)
    assert jnp.allclose(data["edge_lengths"], el, atol=1e-5, rtol=1e-5)

    print("KERNEL_OK")
</pallas_src>

<mosaic_0001>
module attributes {stable_mosaic.version = 11 : i64} {
  func.func @_cutoff_kernel(%arg0: i32, %arg1: memref<3x128xf32, #tpu.memory_space<vmem>>, %arg2: memref<2x128xf32, #tpu.memory_space<vmem>>) attributes {dimension_semantics = [#tpu.dimension_semantics<parallel>], iteration_bounds = array<i64: 1>, scalar_prefetch = 0 : i64, scratch_operands = 0 : i64, tpu.core_type = #tpu.core_type<tc>, window_params = [{transform_indices = @transform_0, window_bounds = array<i64: 3, 128>}, {transform_indices = @transform_1, window_bounds = array<i64: 2, 128>}]} {
    %c0 = arith.constant 0 : index
    %c0_0 = arith.constant 0 : index
    %0 = vector.load %arg1[%c0, %c0_0] : memref<3x128xf32, #tpu.memory_space<vmem>>, vector<1x128xf32>
    %c1 = arith.constant 1 : index
    %c0_1 = arith.constant 0 : index
    %1 = vector.load %arg1[%c1, %c0_1] : memref<3x128xf32, #tpu.memory_space<vmem>>, vector<1x128xf32>
    %c2 = arith.constant 2 : index
    %c0_2 = arith.constant 0 : index
    %2 = vector.load %arg1[%c2, %c0_2] : memref<3x128xf32, #tpu.memory_space<vmem>>, vector<1x128xf32>
    %3 = arith.mulf %0, %0 : vector<1x128xf32>
    %4 = arith.mulf %1, %1 : vector<1x128xf32>
    %5 = arith.addf %3, %4 : vector<1x128xf32>
    %6 = arith.mulf %2, %2 : vector<1x128xf32>
    %7 = arith.addf %5, %6 : vector<1x128xf32>
    %8 = math.sqrt %7 : vector<1x128xf32>
    %cst = arith.constant 4.000000e-01 : f32
    %9 = vector.broadcast %cst : f32 to vector<1x128xf32>
    %10 = arith.mulf %8, %9 : vector<1x128xf32>
    %11 = arith.mulf %10, %10 : vector<1x128xf32>
    %12 = arith.mulf %11, %11 : vector<1x128xf32>
    %13 = arith.mulf %11, %12 : vector<1x128xf32>
    %cst_3 = arith.constant 0.000000e+00 : f32
    %cst_4 = arith.constant 2.800000e+01 : f32
    %14 = arith.subf %cst_3, %cst_4 : f32
    %cst_5 = arith.constant 2.100000e+01 : f32
    %15 = vector.broadcast %cst_5 : f32 to vector<1x128xf32>
    %16 = arith.mulf %15, %10 : vector<1x128xf32>
    %cst_6 = arith.constant 4.800000e+01 : f32
    %17 = vector.broadcast %cst_6 : f32 to vector<1x128xf32>
    %18 = arith.subf %17, %16 : vector<1x128xf32>
    %19 = arith.mulf %10, %18 : vector<1x128xf32>
    %20 = vector.broadcast %14 : f32 to vector<1x128xf32>
    %21 = arith.addf %20, %19 : vector<1x128xf32>
    %22 = arith.mulf %13, %21 : vector<1x128xf32>
    %cst_7 = arith.constant 1.000000e+00 : f32
    %23 = vector.broadcast %cst_7 : f32 to vector<1x128xf32>
    %24 = arith.addf %23, %22 : vector<1x128xf32>
    %cst_8 = arith.constant 1.000000e+00 : f32
    %25 = vector.broadcast %cst_8 : f32 to vector<1x128xf32>
    %26 = arith.cmpf olt, %10, %25 : vector<1x128xf32>
    %cst_9 = arith.constant 0.000000e+00 : f32
    %27 = vector.broadcast %cst_9 : f32 to vector<1x128xf32>
    %28 = arith.select %26, %24, %27 : vector<1x128xi1>, vector<1x128xf32>
    %c0_10 = arith.constant 0 : index
    %c0_11 = arith.constant 0 : index
    %29 = vector.load %arg2[%c0_10, %c0_11] : memref<2x128xf32, #tpu.memory_space<vmem>>, vector<1x128xf32>
    tpu.vector_store %arg2[%c0_10, %c0_11], %8 {strides = array<i32>} : memref<2x128xf32, #tpu.memory_space<vmem>>, vector<1x128xf32>,
    %c1_12 = arith.constant 1 : index
    %c0_13 = arith.constant 0 : index
    %30 = vector.load %arg2[%c1_12, %c0_13] : memref<2x128xf32, #tpu.memory_space<vmem>>, vector<1x128xf32>
    tpu.vector_store %arg2[%c1_12, %c0_13], %28 {strides = array<i32>} : memref<2x128xf32, #tpu.memory_space<vmem>>, vector<1x128xf32>,
    return
  }
  func.func @transform_0(%arg0: i32) -> (i32, i32) {
    %c0_i32 = arith.constant 0 : i32
    %c0_i32_0 = arith.constant 0 : i32
    return %c0_i32, %arg0 : i32, i32
  }
  func.func @transform_1(%arg0: i32) -> (i32, i32) {
    %c0_i32 = arith.constant 0 : i32
    %c0_i32_0 = arith.constant 0 : i32
    return %c0_i32, %arg0 : i32, i32
  }
}

</mosaic_0001>

<bundles_post_ra>
// kernel: tpu_custom_call.1
= control target key start
LH: loop header
LB: loop body
LE: loop exit
PB: predicated region body
PF: predicated region fallthrough
CT: control target
= control target key end

     0   :  { %6 = vsyncpa [#allocation3], 0  ;;  %s153_s0 = inlined_call_operand.hbm [shape: f32[3,128], index: 0, kind: input, shape index: {}]   ;;  %s154_s1 = inlined_call_operand.hbm [shape: f32[2,128], index: 1, kind: output, shape index: {}]  }
   0x1   :  { %7 = vsyncpa [#allocation4], 0  ;;  %s117_s6 = smov [#allocation2]   ;;  %s69_s10 = scalar_lea.hbm %s153_s0, 64 }
   0x2   :  { %s14_s7 = sshll.u32 %s117_s6, 4  ;;  %p70_p0 = scmp.ne.s32.totalorder %s153_s0, %s69_s10  ;;  %s15_s7 = int_to_ptr.vmem [resolvable:$true] %s14_s7 }
   0x3   :  { %p73_p1 = scmp.lt.u32.totalorder %s69_s10, %s153_s0 }
   0x5   :  { %p75_p2 = pnand %p73_p1, %p70_p0 }
   0x7   :  { %78 = shalt.err (!%p75_p2)
}
   0x8   :  { %s79_s15 = scalar_lea.vmem %s15_s7, 64  ;;  %p84_p4 = scmp.lt.s32.totalorder %s15_s7, %s15_s7 }
   0x9   :  { %p80_p3 = scmp.ne.s32.totalorder %s15_s7, %s79_s15  ;;  %p85_p5 = scmp.lt.s32.totalorder %s79_s15, %s79_s15 }
   0xb   :  { %p86_p6 = por %p85_p5, %p84_p4 }
   0xd   :  { %p87_p7 = pnand %p86_p6, %p80_p3 }
   0xf   :  { %90 = shalt.err (!%p87_p7)
}
  0x10   :  { %17 = dma.hbm_to_vmem [thread:$0]  %s153_s0, 64, %s15_s7, [#allocation3]  }
  0x11   :  { %113 = dma.done.wait [#allocation3], 64  }
  0x12   :  { %114 = vsyncadd [#allocation3], 4294967232  ;;  %v21_v0 = vld [vmem:[#allocation2] sm:$0x1]  ;;  %v22_v1 = vld [vmem:[#allocation2 + $0x1] sm:$0x1] }
  0x13   :  { %v23_v2 = vld [vmem:[#allocation2 + $0x2] sm:$0x1]  ;;  %v24_v3 = vmul.f32 %v21_v0, %v21_v0  ;;  %v25_v4 = vmul.f32 %v22_v1, %v22_v1  ;;  %s118_s0 = smov [#allocation5]  }
  0x14   :  { %v27_v5 = vmul.f32 %v23_v2, %v23_v2  ;;  %s56_s18 = sshll.u32 %s118_s0, 4  ;;  %s57_s18 = int_to_ptr.vmem [resolvable:$true] %s56_s18 }
  0x15   :  { %v26_v6 = vadd.f32 %v25_v4, %v24_v3  ;;  %s91_s19 = scalar_lea.vmem %s57_s18, 32  ;;  %p96_p9 = scmp.lt.s32.totalorder %s57_s18, %s57_s18 }
  0x16   :  { %p92_p8 = scmp.ne.s32.totalorder %s57_s18, %s91_s19  ;;  %p97_p10 = scmp.lt.s32.totalorder %s91_s19, %s91_s19 }
  0x17   :  { %v28_v7 = vadd.f32 %v27_v5, %v26_v6 }
  0x18   :  { %p98_p11 = por %p97_p10, %p96_p9 }
  0x19   :  { %67 = vrsqrt.f32 %v28_v7  ;;  %vm31_vm0 = vcmp.eq.f32.partialorder %v28_v7, inf  ;;  %v34_v9 = vand.u32 2147483648, %v28_v7  ;;  %vm33_vm1 = vcmp.eq.f32.partialorder %v28_v7, 0.0 }
  0x1a   :  { %p99_p12 = pnand %p98_p11, %p92_p8 }
  0x23   :  { %v68_v8 = vpop.eup %67 }
  0x24   :  { %v30_v10 = vmul.f32 %v68_v8, %v28_v7 }
  0x26   :  { %v32_v11 = vsel %vm31_vm0, %v28_v7, %v30_v10 }
  0x27   :  { %v35_v12 = vsel %vm33_vm1, %v34_v9, %v32_v11 }
  0x28   :  { %v36_v13 = vmul.f32 0.4, %v35_v12  ;;  %48 = vst [vmem:[#allocation5] sm:$0x1] %v35_v12 }
  0x2a   :  { %v37_v14 = vmul.f32 %v36_v13, %v36_v13  ;;  %v40_v15 = vmul.f32 21.0, %v36_v13  ;;  %vm46_vm2 = vcmp.lt.f32.partialorder %v36_v13, 1.0 }
  0x2c   :  { %v38_v16 = vmul.f32 %v37_v14, %v37_v14  ;;  %v41_v17 = vsub.f32 48.0, %v40_v15 }
  0x2e   :  { %v39_v18 = vmul.f32 %v38_v16, %v37_v14  ;;  %v42_v19 = vmul.f32 %v41_v17, %v36_v13 }
  0x30   :  { %v43_v20 = vadd.f32 -28.0, %v42_v19 }
  0x32   :  { %v44_v21 = vmul.f32 %v43_v20, %v39_v18 }
  0x34   :  { %v45_v22 = vadd.f32 1.0, %v44_v21 }
  0x36   :  { %v47_v23 = vsel %vm46_vm2, %v45_v22, 0.0 }
  0x37   :  { %49 = vst [vmem:[#allocation5 + $0x1] sm:$0x1] %v47_v23 }
  0x38   :  { %102 = shalt.err (!%p99_p12)
}
  0x39   :  { %s103_s22 = scalar_lea.hbm %s154_s1, 32 }
  0x3a   :  { %p104_p13 = scmp.ne.s32.totalorder %s154_s1, %s103_s22  ;;  %p107_p0 = scmp.lt.u32.totalorder %s103_s22, %s154_s1 }
  0x3c   :  { %p109_p1 = pnand %p107_p0, %p104_p13 }
  0x3e   :  { %112 = shalt.err (!%p109_p1)
}
  0x3f   :  { %59 = dma.vmem_to_hbm [thread:$0]  %s57_s18, 32, %s154_s1, [#allocation4]  }
  0x40   :  { %115 = dma.done.wait [#allocation4], 32  }
  0x41   :  { %116 = vsyncadd [#allocation4], 4294967264 }
  0x42   :  { %63 = vsyncpa [#allocation3], 1 }
  0x43   :  { %64 = vsyncpa [#allocation4], 1 }

</bundles_post_ra>
